<compile_context>
chip_gen: v6e
topology: v6e:2x2x1
jax: 0.10.0
libtpu: 0.0.40
codegen_flags: <defaults>
</compile_context>

<pallas_src>
import functools

import jax
import jax.numpy as jnp
from jax.experimental import pallas as pl
from jax.experimental.pallas import tpu as pltpu

LANES = 128
BLOCK_ROWS = 4096   # (4096, 128) f32 block = 2 MiB per input per pipeline buffer


def _num_tensorcores():
    """2 on dual-TensorCore chips (v7x); 1 on v5e/v6e (and on detection failure)."""
    try:
        kind = jax.devices()[0].device_kind.lower()
    except Exception:
        return 1
    return 2 if "v7" in kind else 1


def _fidelity_kernel(p_ref, g_ref, o_ref, *, rows, num_blocks, blocks_per_core, eps):
    c = pl.program_id(0)              # core (parallel) index
    i = pl.program_id(1)              # per-core block (reduction) index
    b = c * blocks_per_core + i       # unclamped logical global block index

    # Output block is resident across the "arbitrary" i axis -> accumulate into
    # it directly (no VMEM scratch, no finalize copy).
    @pl.when(i == 0)
    def _init():
        o_ref[...] = jnp.zeros_like(o_ref)

    p = p_ref[...].astype(jnp.float32)
    g = g_ref[...].astype(jnp.float32)
    block_rows, _ = p_ref.shape       # static block shape

    # Accumulate q = sqrt(p*g + eps) + sqrt((1-p)*(1-g) + eps); the per-element
    # "1 - q" is hoisted to the wrapper.  (1-p)*(1-g) = (p*g - (p+g)) + 1
    # reuses p*g and folds constants.
    pg = p * g
    q = jnp.sqrt(pg + eps) + jnp.sqrt((pg - (p + g)) + (1.0 + eps))

    # Steady-state blocks: fully valid, no masking work at all.
    @pl.when(b < num_blocks - 1)
    def _accum():
        o_ref[...] += jnp.sum(q, axis=0, keepdims=True)[None]

    # Last logical block (and the at-most-one clamped out-of-range step a
    # second core may get): invalid data is row-aligned, so compare a row iota
    # against a scalar `remaining`.  NaNs from sqrt of garbage rows are
    # discarded by the select.
    @pl.when(b >= num_blocks - 1)
    def _accum_masked():
        remaining = rows - b * block_rows          # <= 0 on the duplicate step
        row_ids = jax.lax.broadcasted_iota(jnp.int32, q.shape, 0)
        contrib = jnp.where(row_ids < remaining, q, 0.0)
        o_ref[...] += jnp.sum(contrib, axis=0, keepdims=True)[None]


def _sqrt_sum_xla(p, g, eps):
    p = p.astype(jnp.float32)
    g = g.astype(jnp.float32)
    return jnp.sum(jnp.sqrt(p * g + eps) + jnp.sqrt((1.0 - p) * (1.0 - g) + eps))


def fidelity_loss(p, g, loss_weight=1.0, eps=1e-8):
    """Pallas TPU implementation of FidelityLoss.forward(p, g)."""
    assert p.shape == g.shape, "p and g must have the same shape"
    p_flat = jnp.ravel(p)
    g_flat = jnp.ravel(g)
    if not jnp.issubdtype(p_flat.dtype, jnp.floating):
        p_flat = p_flat.astype(jnp.float32)
    if not jnp.issubdtype(g_flat.dtype, jnp.floating):
        g_flat = g_flat.astype(jnp.float32)
    n_total = int(p_flat.shape[0])
    assert n_total > 0

    n_main = (n_total // LANES) * LANES   # 128-aligned prefix handled by the kernel
    tail = n_total - n_main               # < 128 ragged elements handled in XLA

    sqrt_sum = jnp.float32(0.0)
    if tail:
        # Tiny (<128 elem) tail in plain XLA instead of a full-array jnp.pad copy.
        # TODO(synk): guarantee 128-alignment upstream to also drop the prefix slice.
        sqrt_sum = sqrt_sum + _sqrt_sum_xla(p_flat[n_main:], g_flat[n_main:], eps)

    if n_main:
        rows = n_main // LANES
        assert rows + BLOCK_ROWS < 2 ** 31          # in-kernel int32 row-index math
        p2 = (p_flat if tail == 0 else p_flat[:n_main]).reshape(rows, LANES)
        g2 = (g_flat if tail == 0 else g_flat[:n_main]).reshape(rows, LANES)

        block_rows = min(BLOCK_ROWS, rows)          # == rows (full dim) for small inputs
        num_blocks = int(pl.cdiv(rows, block_rows))
        num_cores = _num_tensorcores() if num_blocks > 1 else 1
        blocks_per_core = int(pl.cdiv(num_blocks, num_cores))

        def in_map(c, i):
            # Clamp so the (at most one) out-of-range step on the last core still
            # issues an in-bounds DMA; its contribution is fully masked to zero.
            return (jnp.minimum(c * blocks_per_core + i, num_blocks - 1), 0)

        kernel = functools.partial(
            _fidelity_kernel,
            rows=rows,
            num_blocks=num_blocks,
            blocks_per_core=blocks_per_core,
            eps=float(eps),
        )

        block_bytes = block_rows * LANES * p2.dtype.itemsize
        # 2 inputs x 2 pipeline buffers x block, plus headroom (min 16 MiB).
        vmem_limit = int(max(2 * 2 * block_bytes + (4 << 20), 16 << 20))

        partials = pl.pallas_call(
            kernel,
            out_shape=jax.ShapeDtypeStruct((num_cores, 1, LANES), jnp.float32),
            grid_spec=pltpu.PrefetchScalarGridSpec(
                num_scalar_prefetch=0,
                grid=(num_cores, blocks_per_core),
                in_specs=[
                    pl.BlockSpec((block_rows, LANES), in_map),
                    pl.BlockSpec((block_rows, LANES), in_map),
                ],
                out_specs=pl.BlockSpec((1, 1, LANES), lambda c, i: (c, 0, 0)),
            ),
            compiler_params=pltpu.CompilerParams(
                # TODO(synk): on v7x verify in xprof that the outer axis really
                # shards across both TensorCores (else switch to CORE_PARALLEL).
                dimension_semantics=("parallel", "arbitrary"),
                vmem_limit_bytes=vmem_limit,
            ),
        )(p2, g2)

        sqrt_sum = sqrt_sum + jnp.sum(partials)

    # sum over all elements of (1 - q)  ==  n_total - sqrt_sum
    return (jnp.float32(n_total) - sqrt_sum) * (float(loss_weight) / float(n_total))


def fidelity_loss_ref(p, g, loss_weight=1.0, eps=1e-8):
    p = jnp.ravel(p).astype(jnp.float32)
    g = jnp.ravel(g).astype(jnp.float32)
    loss = 1.0 - (jnp.sqrt(p * g + eps) + jnp.sqrt((1.0 - p) * (1.0 - g) + eps))
    return jnp.mean(loss_weight * loss)


if __name__ == "__main__":
    key = jax.random.PRNGKey(0)
    k1, k2, k3, k4, k5, k6 = jax.random.split(key, 6)

    # Shape implied by the module: probability-like maps, e.g. NCHW [2, 4, 16, 16].
    shape = (2, 4, 16, 16)
    p = jax.random.uniform(k1, shape, dtype=jnp.float32)
    g = jax.random.uniform(k2, shape, dtype=jnp.float32)
    out = jax.block_until_ready(fidelity_loss(p, g, loss_weight=1.0))
    ref = fidelity_loss_ref(p, g, loss_weight=1.0)
    assert jnp.allclose(out, ref, atol=1e-5, rtol=1e-5), (out, ref)

    # Ragged size (n % 128 != 0): exercises the XLA tail + aligned-prefix path.
    shape = (3, 7, 31)
    p = jax.random.uniform(k3, shape, dtype=jnp.float32)
    g = jax.random.uniform(k4, shape, dtype=jnp.float32)
    out = jax.block_until_ready(fidelity_loss(p, g, loss_weight=0.5))
    ref = fidelity_loss_ref(p, g, loss_weight=0.5)
    assert jnp.allclose(out, ref, atol=1e-5, rtol=1e-5), (out, ref)

    # Multi-block size: exercises accumulation + the masked partial last block.
    shape = (2, 3, 320, 320)
    p = jax.random.uniform(k5, shape, dtype=jnp.float32)
    g = jax.random.uniform(k6, shape, dtype=jnp.float32)
    out = jax.block_until_ready(fidelity_loss(p, g, loss_weight=1.0))
    ref = fidelity_loss_ref(p, g, loss_weight=1.0)
    assert jnp.allclose(out, ref, atol=1e-5, rtol=1e-5), (out, ref)

    print("KERNEL_OK")
</pallas_src>

<mosaic_0001>
module attributes {stable_mosaic.version = 11 : i64} {
  func.func @_fidelity_kernel(%arg0: i32, %arg1: i32, %arg2: memref<16x128xf32, #tpu.memory_space<vmem>>, %arg3: memref<16x128xf32, #tpu.memory_space<vmem>>, %arg4: memref<1x1x128xf32, #tpu.memory_space<vmem>>) attributes {dimension_semantics = [#tpu.dimension_semantics<parallel>, #tpu.dimension_semantics<arbitrary>], iteration_bounds = array<i64: 1, 1>, scalar_prefetch = 0 : i64, scratch_operands = 0 : i64, tpu.core_type = #tpu.core_type<tc>, window_params = [{transform_indices = @transform_0, window_bounds = array<i64: 16, 128>}, {transform_indices = @transform_1, window_bounds = array<i64: 16, 128>}, {transform_indices = @transform_2, window_bounds = array<i64: 1, 1, 128>}]} {
    %c1_i32 = arith.constant 1 : i32
    %0 = arith.muli %arg0, %c1_i32 : i32
    %1 = arith.addi %0, %arg1 : i32
    %c0_i32 = arith.constant 0 : i32
    %2 = arith.cmpi eq, %arg1, %c0_i32 : i32
    %3 = arith.extui %2 : i1 to i32
    %c0_i32_0 = arith.constant 0 : i32
    %4 = arith.cmpi ne, %3, %c0_i32_0 : i32
    scf.if %4 {
      %cst_9 = arith.constant 0.000000e+00 : f32
      %23 = vector.broadcast %cst_9 : f32 to vector<1x1x128xf32>
      %c0_10 = arith.constant 0 : index
      %c0_11 = arith.constant 0 : index
      %c0_12 = arith.constant 0 : index
      %24 = vector.load %arg4[%c0_10, %c0_11, %c0_12] : memref<1x1x128xf32, #tpu.memory_space<vmem>>, vector<1x1x128xf32>
      tpu.vector_store %arg4[%c0_10, %c0_11, %c0_12], %23 {strides = array<i32>} : memref<1x1x128xf32, #tpu.memory_space<vmem>>, vector<1x1x128xf32>,
    } else {
    }
    %c0 = arith.constant 0 : index
    %c0_1 = arith.constant 0 : index
    %5 = vector.load %arg2[%c0, %c0_1] : memref<16x128xf32, #tpu.memory_space<vmem>>, vector<16x128xf32>
    %c0_2 = arith.constant 0 : index
    %c0_3 = arith.constant 0 : index
    %6 = vector.load %arg3[%c0_2, %c0_3] : memref<16x128xf32, #tpu.memory_space<vmem>>, vector<16x128xf32>
    %7 = arith.mulf %5, %6 : vector<16x128xf32>
    %cst = arith.constant 9.99999993E-9 : f32
    %8 = vector.broadcast %cst : f32 to vector<16x128xf32>
    %9 = arith.addf %7, %8 : vector<16x128xf32>
    %10 = math.sqrt %9 : vector<16x128xf32>
    %11 = arith.addf %5, %6 : vector<16x128xf32>
    %12 = arith.subf %7, %11 : vector<16x128xf32>
    %cst_4 = arith.constant 1.000000e+00 : f32
    %13 = vector.broadcast %cst_4 : f32 to vector<16x128xf32>
    %14 = arith.addf %12, %13 : vector<16x128xf32>
    %15 = math.sqrt %14 : vector<16x128xf32>
    %16 = arith.addf %10, %15 : vector<16x128xf32>
    %c0_i32_5 = arith.constant 0 : i32
    %17 = arith.cmpi slt, %1, %c0_i32_5 : i32
    %18 = arith.extui %17 : i1 to i32
    %c0_i32_6 = arith.constant 0 : i32
    %19 = arith.cmpi ne, %18, %c0_i32_6 : i32
    scf.if %19 {
      %c0_9 = arith.constant 0 : index
      %c0_10 = arith.constant 0 : index
      %c0_11 = arith.constant 0 : index
      %23 = vector.load %arg4[%c0_9, %c0_10, %c0_11] : memref<1x1x128xf32, #tpu.memory_space<vmem>>, vector<1x1x128xf32>
      %cst_12 = arith.constant dense<0.000000e+00> : vector<128xf32>
      %24 = vector.multi_reduction <add>, %16, %cst_12 [0] : vector<16x128xf32> to vector<128xf32>
      %25 = vector.shape_cast %24 : vector<128xf32> to vector<1x128xf32>
      %26 = vector.shape_cast %25 : vector<1x128xf32> to vector<1x1x128xf32>
      %27 = arith.addf %23, %26 : vector<1x1x128xf32>
      %c0_13 = arith.constant 0 : index
      %c0_14 = arith.constant 0 : index
      %c0_15 = arith.constant 0 : index
      %28 = vector.load %arg4[%c0_13, %c0_14, %c0_15] : memref<1x1x128xf32, #tpu.memory_space<vmem>>, vector<1x1x128xf32>
      tpu.vector_store %arg4[%c0_13, %c0_14, %c0_15], %27 {strides = array<i32>} : memref<1x1x128xf32, #tpu.memory_space<vmem>>, vector<1x1x128xf32>,
    } else {
    }
    %c0_i32_7 = arith.constant 0 : i32
    %20 = arith.cmpi sge, %1, %c0_i32_7 : i32
    %21 = arith.extui %20 : i1 to i32
    %c0_i32_8 = arith.constant 0 : i32
    %22 = arith.cmpi ne, %21, %c0_i32_8 : i32
    scf.if %22 {
      %c16_i32 = arith.constant 16 : i32
      %23 = arith.muli %1, %c16_i32 : i32
      %c16_i32_9 = arith.constant 16 : i32
      %24 = arith.subi %c16_i32_9, %23 : i32
      %25 = tpu.iota {dimensions = array<i32: 0>} : vector<16x128xi32>
      %26 = vector.broadcast %24 : i32 to vector<16x128xi32>
      %27 = arith.cmpi slt, %25, %26 : vector<16x128xi32>
      %cst_10 = arith.constant 0.000000e+00 : f32
      %28 = vector.broadcast %cst_10 : f32 to vector<16x128xf32>
      %29 = arith.select %27, %16, %28 : vector<16x128xi1>, vector<16x128xf32>
      %c0_11 = arith.constant 0 : index
      %c0_12 = arith.constant 0 : index
      %c0_13 = arith.constant 0 : index
      %30 = vector.load %arg4[%c0_11, %c0_12, %c0_13] : memref<1x1x128xf32, #tpu.memory_space<vmem>>, vector<1x1x128xf32>
      %cst_14 = arith.constant dense<0.000000e+00> : vector<128xf32>
      %31 = vector.multi_reduction <add>, %29, %cst_14 [0] : vector<16x128xf32> to vector<128xf32>
      %32 = vector.shape_cast %31 : vector<128xf32> to vector<1x128xf32>
      %33 = vector.shape_cast %32 : vector<1x128xf32> to vector<1x1x128xf32>
      %34 = arith.addf %30, %33 : vector<1x1x128xf32>
      %c0_15 = arith.constant 0 : index
      %c0_16 = arith.constant 0 : index
      %c0_17 = arith.constant 0 : index
      %35 = vector.load %arg4[%c0_15, %c0_16, %c0_17] : memref<1x1x128xf32, #tpu.memory_space<vmem>>, vector<1x1x128xf32>
      tpu.vector_store %arg4[%c0_15, %c0_16, %c0_17], %34 {strides = array<i32>} : memref<1x1x128xf32, #tpu.memory_space<vmem>>, vector<1x1x128xf32>,
    } else {
    }
    return
  }
  func.func @transform_0(%arg0: i32, %arg1: i32) -> (i32, i32) {
    %c1_i32 = arith.constant 1 : i32
    %0 = arith.muli %arg0, %c1_i32 : i32
    %1 = arith.addi %0, %arg1 : i32
    %c0_i32 = arith.constant 0 : i32
    %2 = arith.minsi %1, %c0_i32 : i32
    %c0_i32_0 = arith.constant 0 : i32
    %c0_i32_1 = arith.constant 0 : i32
    return %2, %c0_i32_0 : i32, i32
  }
  func.func @transform_1(%arg0: i32, %arg1: i32) -> (i32, i32) {
    %c1_i32 = arith.constant 1 : i32
    %0 = arith.muli %arg0, %c1_i32 : i32
    %1 = arith.addi %0, %arg1 : i32
    %c0_i32 = arith.constant 0 : i32
    %2 = arith.minsi %1, %c0_i32 : i32
    %c0_i32_0 = arith.constant 0 : i32
    %c0_i32_1 = arith.constant 0 : i32
    return %2, %c0_i32_0 : i32, i32
  }
  func.func @transform_2(%arg0: i32, %arg1: i32) -> (i32, i32, i32) {
    %c0_i32 = arith.constant 0 : i32
    %c0_i32_0 = arith.constant 0 : i32
    %c0_i32_1 = arith.constant 0 : i32
    return %arg0, %c0_i32, %c0_i32_0 : i32, i32, i32
  }
}

</mosaic_0001>

<bundles_post_ra>
// kernel: tpu_custom_call.1
= control target key start
LH: loop header
LB: loop body
LE: loop exit
PB: predicated region body
PF: predicated region fallthrough
CT: control target
= control target key end

     0   :  { %7 = vsyncpa [#allocation3], 0  ;;  %s278_s0 = inlined_call_operand.hbm [shape: f32[16,128], index: 0, kind: input, shape index: {}]   ;;  %s279_s1 = inlined_call_operand.hbm [shape: f32[16,128], index: 1, kind: input, shape index: {}]   ;;  %s280_s2 = inlined_call_operand.hbm [shape: f32[1,1,128], index: 2, kind: output, shape index: {}]  }
   0x1   :  { %8 = vsyncpa [#allocation6], 0 }
   0x2   :  { %9 = vsyncpa [#allocation4], 0  ;;  %s248_s9 = smov [#allocation2]  }
   0x3   :  { %s21_s10 = sshll.u32 %s248_s9, 4  ;;  %s22_s10 = int_to_ptr.vmem [resolvable:$true] %s21_s10 }
   0x4   :  { %s190_s11 = scalar_lea.vmem %s22_s10, 256  ;;  %p195_p1 = scmp.lt.s32.totalorder %s22_s10, %s22_s10 }
   0x5   :  { %p191_p0 = scmp.ne.s32.totalorder %s22_s10, %s190_s11  ;;  %p196_p2 = scmp.lt.s32.totalorder %s190_s11, %s190_s11 }
   0x7   :  { %p197_p3 = por %p196_p2, %p195_p1 }
   0x9   :  { %p198_p4 = pnand %p197_p3, %p191_p0 }
   0xb   :  { %201 = shalt.err (!%p198_p4)
}
   0xc   :  { %s249_s12 = smov 128   ;;  %s250_s13 = smov 8  }
   0xd   :  { %27 = dma.hbm_to_vmem [thread:$0]  %s278_s0, 256, %s22_s10, [#allocation3], %s249_s12, %s249_s12, %s250_s13  }
   0xe   :  { %s251_s16 = smov [#allocation5]  }
   0xf   :  { %s39_s17 = sshll.u32 %s251_s16, 4  ;;  %s40_s17 = int_to_ptr.vmem [resolvable:$true] %s39_s17 }
  0x10   :  { %s210_s18 = scalar_lea.vmem %s40_s17, 256  ;;  %p215_p6 = scmp.lt.s32.totalorder %s40_s17, %s40_s17 }
  0x11   :  { %p211_p5 = scmp.ne.s32.totalorder %s40_s17, %s210_s18  ;;  %p216_p7 = scmp.lt.s32.totalorder %s210_s18, %s210_s18 }
  0x13   :  { %p217_p8 = por %p216_p7, %p215_p6 }
  0x15   :  { %p218_p9 = pnand %p217_p8, %p211_p5 }
  0x17   :  { %221 = shalt.err (!%p218_p9)
}
  0x18   :  { %45 = dma.hbm_to_vmem [thread:$0]  %s279_s1, 256, %s40_s17, [#allocation6], %s249_s12, %s249_s12, %s250_s13  }
  0x19   :  { %242 = dma.done.wait [#allocation3], 256  }
  0x1a   :  { %243 = vsyncadd [#allocation3], 4294967040 }
  0x1b   :  { %244 = dma.done.wait [#allocation6], 256  }
  0x1c   :  { %245 = vsyncadd [#allocation6], 4294967040  ;;  %v252_v0 = vmov 0.0   ;;  %v66_v1 = vld [vmem:[#allocation2] sm:$0xff]  ;;  %v67_v2 = vld [vmem:[#allocation2 + $0x8] sm:$0xff]  ;;  %s253_s0 = smov [#allocation7]  }
  0x1d   :  { %65 = vst [vmem:[#allocation7] sm:$0x1] %v252_v0  ;;  %v68_v3 = vld [vmem:[#allocation5] sm:$0xff]  ;;  %v69_v4 = vld [vmem:[#allocation5 + $0x8] sm:$0xff]  ;;  %s154_s1 = sshll.u32 %s253_s0, 4  ;;  %s155_s1 = int_to_ptr.vmem [resolvable:$true] %s154_s1 }
  0x1e   :  { %v70_v5 = vmul.f32 %v68_v3, %v66_v1  ;;  %v88_v6 = vadd.f32 %v68_v3, %v66_v1  ;;  %v71_v7 = vmul.f32 %v69_v4, %v67_v2  ;;  %v89_v8 = vadd.f32 %v69_v4, %v67_v2  ;;  %s222_s21 = scalar_lea.vmem %s155_s1, 16  ;;  %s226_s22 = scalar_lea.vmem %s155_s1, 32 }
  0x1f   :  { %p223_p10 = scmp.ne.s32.totalorder %s155_s1, %s222_s21  ;;  %p227_p11 = scmp.lt.s32.totalorder %s155_s1, %s155_s1 }
  0x20   :  { %v72_v9 = vadd.f32 1e-08, %v70_v5  ;;  %v90_v10 = vsub.f32 %v70_v5, %v88_v6  ;;  %v73_v11 = vadd.f32 1e-08, %v71_v7  ;;  %v91_v12 = vsub.f32 %v71_v7, %v89_v8  ;;  %p228_p12 = scmp.lt.s32.totalorder %s226_s22, %s222_s21 }
  0x22   :  { %174 = vrsqrt.f32 %v72_v9  ;;  %v92_v13 = vadd.f32 1.0, %v90_v10  ;;  %v93_v14 = vadd.f32 1.0, %v91_v12  ;;  %vm76_vm0 = vcmp.eq.f32.partialorder %v72_v9, inf  ;;  %p229_p13 = por %p228_p12, %p227_p11 }
  0x23   :  { %176 = vrsqrt.f32 %v73_v11  ;;  %vm83_vm1 = vcmp.eq.f32.partialorder %v73_v11, inf  ;;  %v79_v18 = vand.u32 2147483648, %v72_v9  ;;  %vm78_vm2 = vcmp.eq.f32.partialorder %v72_v9, 0.0 }
  0x24   :  { %178 = vrsqrt.f32 %v92_v13  ;;  %v86_v21 = vand.u32 2147483648, %v73_v11  ;;  %vm85_vm3 = vcmp.eq.f32.partialorder %v73_v11, 0.0  ;;  %vm96_vm4 = vcmp.eq.f32.partialorder %v92_v13, inf  ;;  %v138_v43 = vld [vmem:[#allocation7] sm:$0x1]  ;;  %p230_p0 = pnand %p229_p13, %p223_p10 }
  0x25   :  { %180 = vrsqrt.f32 %v93_v14  ;;  %v99_v24 = vand.u32 2147483648, %v92_v13  ;;  %vm98_vm5 = vcmp.eq.f32.partialorder %v92_v13, 0.0  ;;  %vm103_vm6 = vcmp.eq.f32.partialorder %v93_v14, inf }
  0x26   :  { %v106_v27 = vand.u32 2147483648, %v93_v14  ;;  %vm105_vm7 = vcmp.eq.f32.partialorder %v93_v14, 0.0 }
  0x2f   :  { %v175_v15 = vpop.eup %174 }
  0x30   :  { %v177_v16 = vpop.eup %176  ;;  %v75_v17 = vmul.f32 %v175_v15, %v72_v9 }
  0x31   :  { %v82_v19 = vmul.f32 %v177_v16, %v73_v11  ;;  %v179_v22 = vpop.eup %178 }
  0x32   :  { %v77_v20 = vsel %vm76_vm0, %v72_v9, %v75_v17  ;;  %v181_v25 = vpop.eup %180  ;;  %v95_v26 = vmul.f32 %v179_v22, %v92_v13 }
  0x33   :  { %v84_v23 = vsel %vm83_vm1, %v73_v11, %v82_v19  ;;  %v80_v28 = vsel %vm78_vm2, %v79_v18, %v77_v20  ;;  %v102_v29 = vmul.f32 %v181_v25, %v93_v14 }
  0x34   :  { %v87_v30 = vsel %vm85_vm3, %v86_v21, %v84_v23  ;;  %v97_v31 = vsel %vm96_vm4, %v92_v13, %v95_v26 }
  0x35   :  { %v100_v32 = vsel %vm98_vm5, %v99_v24, %v97_v31  ;;  %v104_v33 = vsel %vm103_vm6, %v93_v14, %v102_v29 }
  0x36   :  { %v107_v34 = vsel %vm105_vm7, %v106_v27, %v104_v33  ;;  %v108_v35 = vadd.f32 %v100_v32, %v80_v28 }
  0x37   :  { %v109_v36 = vadd.f32 %v107_v34, %v87_v30 }
  0x39   :  { %v139_v37 = vadd.f32 %v109_v36, %v108_v35 }
  0x3b   :  { %v140_v38 = vrot.slane %v139_v37, 4 }
  0x3d   :  { %v141_v39 = vadd.f32 %v140_v38, %v139_v37 }
  0x3f   :  { %v142_v40 = vrot.slane %v141_v39, 2 }
  0x41   :  { %v143_v41 = vadd.f32 %v142_v40, %v141_v39 }
  0x43   :  { %v144_v42 = vrot.slane %v143_v41, 1 }
  0x45   :  { %v145_v44 = vadd.f32 %v144_v42, %v143_v41 }
  0x47   :  { %v146_v45 = vadd.f32 %v145_v44, %v138_v43 }
  0x49   :  { %147 = vst [vmem:[#allocation7] sm:$0x1] %v146_v45 }
  0x4a   :  { %233 = shalt.err (!%p230_p0)
}
  0x4b   :  { %157 = dma.vmem_to_hbm [thread:$0]  %s155_s1, 16, %s280_s2, [#allocation4]  }
  0x4c   :  { %246 = dma.done.wait [#allocation4], 16  }
  0x4d   :  { %247 = vsyncadd [#allocation4], 4294967280 }
  0x4e   :  { %161 = vsyncpa [#allocation3], 1 }
  0x4f   :  { %162 = vsyncpa [#allocation6], 1 }
  0x50   :  { %163 = vsyncpa [#allocation4], 1 }

</bundles_post_ra>
